<compile_context>
chip_gen: v6e
topology: v6e:2x2x1
jax: 0.10.0
libtpu: 0.0.40
codegen_flags: <defaults>
</compile_context>

<pallas_src>
import jax
import jax.numpy as jnp
from jax.experimental import pallas as pl
from jax.experimental.pallas import tpu as pltpu

HIDDEN_DIM = 128
INPUT_DIM = 28 * 28
NUM_HIDDEN_LAYERS = 4
OUTPUT_DIM = 10

NUM_REPRS = NUM_HIDDEN_LAYERS + 1      # 5 representations share the head
REPS_DIM = NUM_REPRS * HIDDEN_DIM      # 640: reps concatenated lane-wise
HEAD_LANES = 128                       # packed head output width (lane-dense)
HEAD_STRIDE = 16                       # head r occupies lanes [16r, 16r+10)


def _round_up(n, m):
    return ((n + m - 1) // m) * m


def _batch_tiling(batch, max_tile=1024, min_rows_for_split=64):
    """Pick (tile_rows, padded_batch).

    Large tiles amortize the ~0.35us/step grid overhead and MXU fill/drain;
    >=2 grid steps let v7x's two TensorCores split the batch; padding waste
    stays below 8 rows per grid step.
    """
    b8 = _round_up(batch, 8)
    n_steps = pl.cdiv(b8, max_tile)
    if b8 >= min_rows_for_split:
        n_steps = max(n_steps, 2)
    tb = _round_up(pl.cdiv(b8, n_steps), 8)
    return tb, n_steps * tb


def _mlp_shared_head_kernel(
    x_ref,       # (TB, 784)            f32
    w_in_ref,    # (784, 128)           bf16
    b_in_ref,    # (1, 128)             f32
    w_h_ref,     # (4, 128, 128)        bf16
    b_h_ref,     # (4, 1, 128)          f32
    w_out_ref,   # (640, 128)           bf16   block-structured shared head
    b_out_ref,   # (1, 128)             f32    packed head bias
    out_ref,     # (TB, 128)            f32    packed head outputs
    reps_ref,    # scratch (TB, 640)    bf16   the 5 post-ReLU representations
):
    # Input layer + ReLU.  The bf16 cast is a VPU op hidden under the MXU;
    # accumulation stays in f32 via preferred_element_type.
    x_bf = x_ref[...].astype(jnp.bfloat16)
    h = jnp.maximum(
        jnp.dot(x_bf, w_in_ref[...], preferred_element_type=jnp.float32)
        + b_in_ref[...],
        0.0,
    )
    h_bf = h.astype(jnp.bfloat16)
    reps_ref[:, pl.ds(0, HIDDEN_DIM)] = h_bf

    # Hidden layers (static unroll); each representation stashed lane-wise.
    for i in range(NUM_HIDDEN_LAYERS):
        h = jnp.maximum(
            jnp.dot(h_bf, w_h_ref[i], preferred_element_type=jnp.float32)
            + b_h_ref[i],
            0.0,
        )
        h_bf = h.astype(jnp.bfloat16)
        reps_ref[:, pl.ds((i + 1) * HIDDEN_DIM, HIDDEN_DIM)] = h_bf

    # Shared head: all 5 applications fused into ONE (TB,640)@(640,128) matmul.
    # Head r lands in lanes [16r, 16r+10); the remaining lanes stay zero.
    out_ref[...] = (
        jnp.dot(reps_ref[...], w_out_ref[...], preferred_element_type=jnp.float32)
        + b_out_ref[...]
    )


def prepare_params(params):
    """One-time conversion: bf16 weights + block-structured packed head."""
    w_in, b_in, w_h, b_h, w_out, b_out = params
    w_in_p = w_in.astype(jnp.bfloat16)                                  # (784, 128)
    b_in_p = b_in.reshape(1, HIDDEN_DIM).astype(jnp.float32)
    w_h_p = w_h.astype(jnp.bfloat16)                                    # (4, 128, 128)
    b_h_p = b_h.reshape(NUM_HIDDEN_LAYERS, 1, HIDDEN_DIM).astype(jnp.float32)

    # Block-structured shared head: copy r of w_out multiplies representation r
    # (rows [128r, 128(r+1))) and writes output lanes [16r, 16r+10).
    w_out_p = jnp.zeros((REPS_DIM, HEAD_LANES), jnp.bfloat16)
    b_out_p = jnp.zeros((1, HEAD_LANES), jnp.float32)
    for r in range(NUM_REPRS):
        w_out_p = w_out_p.at[
            r * HIDDEN_DIM:(r + 1) * HIDDEN_DIM,
            r * HEAD_STRIDE:r * HEAD_STRIDE + OUTPUT_DIM,
        ].set(w_out.astype(jnp.bfloat16))
        b_out_p = b_out_p.at[
            0, r * HEAD_STRIDE:r * HEAD_STRIDE + OUTPUT_DIM
        ].set(b_out.astype(jnp.float32))
    return (w_in_p, b_in_p, w_h_p, b_h_p, w_out_p, b_out_p)


@jax.jit
def mlp_shared_head_forward(x, prepped_params):
    """Whole MLP (5 matmul stages + fused packed shared head) in one Pallas call."""
    w_in_p, b_in_p, w_h_p, b_h_p, w_out_p, b_out_p = prepped_params
    batch = x.shape[0]
    x2 = x.reshape(batch, -1)                 # mirrors x.view(x.size(0), -1)
    assert x2.shape[1] == INPUT_DIM

    tb, b_pad = _batch_tiling(batch)
    if b_pad != batch:                        # batch-rows pad only; no K pad, no cast copy
        x2 = jnp.pad(x2, ((0, b_pad - batch), (0, 0)))

    flops = 2 * b_pad * (
        INPUT_DIM * HIDDEN_DIM
        + NUM_HIDDEN_LAYERS * HIDDEN_DIM * HIDDEN_DIM
        + REPS_DIM * HEAD_LANES
    )
    bytes_accessed = (
        b_pad * INPUT_DIM * 4
        + (w_in_p.size + w_h_p.size + w_out_p.size) * 2
        + (b_in_p.size + b_h_p.size + b_out_p.size) * 4
        + b_pad * HEAD_LANES * 4
    )

    out = pl.pallas_call(
        _mlp_shared_head_kernel,
        out_shape=jax.ShapeDtypeStruct((b_pad, HEAD_LANES), jnp.float32),
        grid=(b_pad // tb,),
        in_specs=[
            pl.BlockSpec((tb, INPUT_DIM), lambda i: (i, 0)),
            # weights / biases: constant block index -> DMA'd once, VMEM-resident
            pl.BlockSpec((INPUT_DIM, HIDDEN_DIM), lambda i: (0, 0)),
            pl.BlockSpec((1, HIDDEN_DIM), lambda i: (0, 0)),
            pl.BlockSpec((NUM_HIDDEN_LAYERS, HIDDEN_DIM, HIDDEN_DIM),
                         lambda i: (0, 0, 0)),
            pl.BlockSpec((NUM_HIDDEN_LAYERS, 1, HIDDEN_DIM),
                         lambda i: (0, 0, 0)),
            pl.BlockSpec((REPS_DIM, HEAD_LANES), lambda i: (0, 0)),
            pl.BlockSpec((1, HEAD_LANES), lambda i: (0, 0)),
        ],
        out_specs=pl.BlockSpec((tb, HEAD_LANES), lambda i: (i, 0)),
        scratch_shapes=[pltpu.VMEM((tb, REPS_DIM), jnp.bfloat16)],
        compiler_params=pltpu.CompilerParams(
            dimension_semantics=("parallel",)),
        cost_estimate=pl.CostEstimate(
            flops=flops, transcendentals=0, bytes_accessed=bytes_accessed),
    )(x2, w_in_p, b_in_p, w_h_p, b_h_p, w_out_p, b_out_p)

    # Un-pack: head r lives in lanes [16r, 16r+10).
    # Matches the PyTorch module: a list of NUM_REPRS (batch, output_dim) arrays.
    return [
        out[:batch, r * HEAD_STRIDE:r * HEAD_STRIDE + OUTPUT_DIM]
        for r in range(NUM_REPRS)
    ]


def init_params(key):
    """Deterministic init mimicking nn.Linear's U(-1/sqrt(fan_in), 1/sqrt(fan_in)).

    Weights are stored as (in_features, out_features) = transpose of
    nn.Linear.weight, so h = x @ W + b equals PyTorch's x @ W_pt.T + b.
    """
    ks = jax.random.split(key, 6)

    def uniform(k, shape, fan_in):
        bound = 1.0 / jnp.sqrt(jnp.float32(fan_in))
        return jax.random.uniform(k, shape, jnp.float32, -bound, bound)

    w_in = uniform(ks[0], (INPUT_DIM, HIDDEN_DIM), INPUT_DIM)
    b_in = uniform(ks[1], (HIDDEN_DIM,), INPUT_DIM)
    w_h = uniform(ks[2], (NUM_HIDDEN_LAYERS, HIDDEN_DIM, HIDDEN_DIM), HIDDEN_DIM)
    b_h = uniform(ks[3], (NUM_HIDDEN_LAYERS, HIDDEN_DIM), HIDDEN_DIM)
    w_out = uniform(ks[4], (HIDDEN_DIM, OUTPUT_DIM), HIDDEN_DIM)
    b_out = uniform(ks[5], (OUTPUT_DIM,), HIDDEN_DIM)
    return (w_in, b_in, w_h, b_h, w_out, b_out)


def reference_forward(x, params):
    """Pure-JAX reference mirroring the kernel's bf16 rounding (f32 accumulate)."""
    w_in, b_in, w_h, b_h, w_out, b_out = params
    f32 = jnp.float32
    xb = x.reshape(x.shape[0], -1).astype(jnp.bfloat16).astype(f32)
    w_in_b = w_in.astype(jnp.bfloat16).astype(f32)
    w_h_b = w_h.astype(jnp.bfloat16).astype(f32)
    w_out_b = w_out.astype(jnp.bfloat16).astype(f32)
    outs = []
    h = jax.nn.relu(xb @ w_in_b + b_in)
    hb = h.astype(jnp.bfloat16).astype(f32)
    outs.append(hb @ w_out_b + b_out)
    for i in range(NUM_HIDDEN_LAYERS):
        h = jax.nn.relu(hb @ w_h_b[i] + b_h[i])
        hb = h.astype(jnp.bfloat16).astype(f32)
        outs.append(hb @ w_out_b + b_out)
    return outs


if __name__ == "__main__":
    key = jax.random.PRNGKey(0)
    k_params, k_x = jax.random.split(key)

    batch = 8
    # x plays the role of MNIST images (N, 1, 28, 28); forward flattens to (N, 784)
    x = jax.random.normal(k_x, (batch, 1, 28, 28), dtype=jnp.float32)

    params = init_params(k_params)
    prepped = prepare_params(params)   # bf16 / block-structured weights, done once

    outputs = mlp_shared_head_forward(x, prepped)
    outputs = jax.block_until_ready(outputs)

    refs = reference_forward(x, params)
    for got, want in zip(outputs, refs):
        assert got.shape == (batch, OUTPUT_DIM)
        assert jnp.allclose(got, want, atol=1e-2, rtol=1e-2), "mismatch vs reference"

    print("KERNEL_OK")
</pallas_src>

<mosaic_0001>
module attributes {stable_mosaic.version = 11 : i64} {
  func.func @_mlp_shared_head_kernel(%arg0: i32, %arg1: memref<8x784xf32, #tpu.memory_space<vmem>>, %arg2: memref<784x128xbf16, #tpu.memory_space<vmem>>, %arg3: memref<1x128xf32, #tpu.memory_space<vmem>>, %arg4: memref<4x128x128xbf16, #tpu.memory_space<vmem>>, %arg5: memref<4x1x128xf32, #tpu.memory_space<vmem>>, %arg6: memref<640x128xbf16, #tpu.memory_space<vmem>>, %arg7: memref<1x128xf32, #tpu.memory_space<vmem>>, %arg8: memref<8x128xf32, #tpu.memory_space<vmem>>, %arg9: memref<8x640xbf16, #tpu.memory_space<vmem>>) attributes {dimension_semantics = [#tpu.dimension_semantics<parallel>], iteration_bounds = array<i64: 1>, scalar_prefetch = 0 : i64, scratch_operands = 1 : i64, tpu.core_type = #tpu.core_type<tc>, window_params = [{transform_indices = @transform_0, window_bounds = array<i64: 8, 784>}, {pipeline_mode = #tpu.pipeline_mode<synchronous>, transform_indices = @transform_1, window_bounds = array<i64: 784, 128>}, {pipeline_mode = #tpu.pipeline_mode<synchronous>, transform_indices = @transform_2, window_bounds = array<i64: 1, 128>}, {pipeline_mode = #tpu.pipeline_mode<synchronous>, transform_indices = @transform_3, window_bounds = array<i64: 4, 128, 128>}, {pipeline_mode = #tpu.pipeline_mode<synchronous>, transform_indices = @transform_4, window_bounds = array<i64: 4, 1, 128>}, {pipeline_mode = #tpu.pipeline_mode<synchronous>, transform_indices = @transform_5, window_bounds = array<i64: 640, 128>}, {pipeline_mode = #tpu.pipeline_mode<synchronous>, transform_indices = @transform_6, window_bounds = array<i64: 1, 128>}, {transform_indices = @transform_7, window_bounds = array<i64: 8, 128>}]} {
    %c0 = arith.constant 0 : index
    %c0_0 = arith.constant 0 : index
    %0 = vector.load %arg1[%c0, %c0_0] : memref<8x784xf32, #tpu.memory_space<vmem>>, vector<8x784xf32>
    %1 = arith.truncf %0 : vector<8x784xf32> to vector<8x784xbf16>
    %c0_1 = arith.constant 0 : index
    %c0_2 = arith.constant 0 : index
    %2 = vector.load %arg2[%c0_1, %c0_2] : memref<784x128xbf16, #tpu.memory_space<vmem>>, vector<784x128xbf16>
    %cst = arith.constant dense<0.000000e+00> : vector<8x128xf32>
    %3 = tpu.matmul %1, %2, %cst {dimension_numbers = #tpu.dot_dimension_numbers<[1], [0], [0], [1], [0, 0, 1, 1], [], []>} : vector<8x784xbf16>, vector<784x128xbf16>, vector<8x128xf32> -> vector<8x128xf32>
    %c0_3 = arith.constant 0 : index
    %c0_4 = arith.constant 0 : index
    %4 = vector.load %arg3[%c0_3, %c0_4] : memref<1x128xf32, #tpu.memory_space<vmem>>, vector<1x128xf32>
    %5 = vector.broadcast %4 : vector<1x128xf32> to vector<8x128xf32>
    %6 = arith.addf %3, %5 : vector<8x128xf32>
    %cst_5 = arith.constant 0.000000e+00 : f32
    %7 = vector.broadcast %cst_5 : f32 to vector<8x128xf32>
    %8 = arith.maximumf %6, %7 : vector<8x128xf32>
    %9 = arith.truncf %8 : vector<8x128xf32> to vector<8x128xbf16>
    %c0_6 = arith.constant 0 : index
    %c0_7 = arith.constant 0 : index
    %10 = vector.load %arg9[%c0_6, %c0_7] : memref<8x640xbf16, #tpu.memory_space<vmem>>, vector<8x128xbf16>
    tpu.vector_store %arg9[%c0_6, %c0_7], %9 {strides = array<i32>} : memref<8x640xbf16, #tpu.memory_space<vmem>>, vector<8x128xbf16>,
    %c0_8 = arith.constant 0 : index
    %c0_9 = arith.constant 0 : index
    %c0_10 = arith.constant 0 : index
    %11 = vector.load %arg4[%c0_8, %c0_9, %c0_10] : memref<4x128x128xbf16, #tpu.memory_space<vmem>>, vector<1x128x128xbf16>
    %12 = vector.shape_cast %11 : vector<1x128x128xbf16> to vector<128x128xbf16>
    %cst_11 = arith.constant dense<0.000000e+00> : vector<8x128xf32>
    %13 = tpu.matmul %9, %12, %cst_11 {dimension_numbers = #tpu.dot_dimension_numbers<[1], [0], [0], [1], [0, 0, 1, 1], [], []>} : vector<8x128xbf16>, vector<128x128xbf16>, vector<8x128xf32> -> vector<8x128xf32>
    %c0_12 = arith.constant 0 : index
    %c0_13 = arith.constant 0 : index
    %c0_14 = arith.constant 0 : index
    %14 = vector.load %arg5[%c0_12, %c0_13, %c0_14] : memref<4x1x128xf32, #tpu.memory_space<vmem>>, vector<1x1x128xf32>
    %15 = vector.shape_cast %14 : vector<1x1x128xf32> to vector<1x128xf32>
    %16 = vector.broadcast %15 : vector<1x128xf32> to vector<8x128xf32>
    %17 = arith.addf %13, %16 : vector<8x128xf32>
    %cst_15 = arith.constant 0.000000e+00 : f32
    %18 = vector.broadcast %cst_15 : f32 to vector<8x128xf32>
    %19 = arith.maximumf %17, %18 : vector<8x128xf32>
    %20 = arith.truncf %19 : vector<8x128xf32> to vector<8x128xbf16>
    %c0_16 = arith.constant 0 : index
    %c128 = arith.constant 128 : index
    %21 = vector.load %arg9[%c0_16, %c128] : memref<8x640xbf16, #tpu.memory_space<vmem>>, vector<8x128xbf16>
    tpu.vector_store %arg9[%c0_16, %c128], %20 {strides = array<i32>} : memref<8x640xbf16, #tpu.memory_space<vmem>>, vector<8x128xbf16>,
    %c1 = arith.constant 1 : index
    %c0_17 = arith.constant 0 : index
    %c0_18 = arith.constant 0 : index
    %22 = vector.load %arg4[%c1, %c0_17, %c0_18] : memref<4x128x128xbf16, #tpu.memory_space<vmem>>, vector<1x128x128xbf16>
    %23 = vector.shape_cast %22 : vector<1x128x128xbf16> to vector<128x128xbf16>
    %cst_19 = arith.constant dense<0.000000e+00> : vector<8x128xf32>
    %24 = tpu.matmul %20, %23, %cst_19 {dimension_numbers = #tpu.dot_dimension_numbers<[1], [0], [0], [1], [0, 0, 1, 1], [], []>} : vector<8x128xbf16>, vector<128x128xbf16>, vector<8x128xf32> -> vector<8x128xf32>
    %c1_20 = arith.constant 1 : index
    %c0_21 = arith.constant 0 : index
    %c0_22 = arith.constant 0 : index
    %25 = vector.load %arg5[%c1_20, %c0_21, %c0_22] : memref<4x1x128xf32, #tpu.memory_space<vmem>>, vector<1x1x128xf32>
    %26 = vector.shape_cast %25 : vector<1x1x128xf32> to vector<1x128xf32>
    %27 = vector.broadcast %26 : vector<1x128xf32> to vector<8x128xf32>
    %28 = arith.addf %24, %27 : vector<8x128xf32>
    %cst_23 = arith.constant 0.000000e+00 : f32
    %29 = vector.broadcast %cst_23 : f32 to vector<8x128xf32>
    %30 = arith.maximumf %28, %29 : vector<8x128xf32>
    %31 = arith.truncf %30 : vector<8x128xf32> to vector<8x128xbf16>
    %c0_24 = arith.constant 0 : index
    %c256 = arith.constant 256 : index
    %32 = vector.load %arg9[%c0_24, %c256] : memref<8x640xbf16, #tpu.memory_space<vmem>>, vector<8x128xbf16>
    tpu.vector_store %arg9[%c0_24, %c256], %31 {strides = array<i32>} : memref<8x640xbf16, #tpu.memory_space<vmem>>, vector<8x128xbf16>,
    %c2 = arith.constant 2 : index
    %c0_25 = arith.constant 0 : index
    %c0_26 = arith.constant 0 : index
    %33 = vector.load %arg4[%c2, %c0_25, %c0_26] : memref<4x128x128xbf16, #tpu.memory_space<vmem>>, vector<1x128x128xbf16>
    %34 = vector.shape_cast %33 : vector<1x128x128xbf16> to vector<128x128xbf16>
    %cst_27 = arith.constant dense<0.000000e+00> : vector<8x128xf32>
    %35 = tpu.matmul %31, %34, %cst_27 {dimension_numbers = #tpu.dot_dimension_numbers<[1], [0], [0], [1], [0, 0, 1, 1], [], []>} : vector<8x128xbf16>, vector<128x128xbf16>, vector<8x128xf32> -> vector<8x128xf32>
    %c2_28 = arith.constant 2 : index
    %c0_29 = arith.constant 0 : index
    %c0_30 = arith.constant 0 : index
    %36 = vector.load %arg5[%c2_28, %c0_29, %c0_30] : memref<4x1x128xf32, #tpu.memory_space<vmem>>, vector<1x1x128xf32>
    %37 = vector.shape_cast %36 : vector<1x1x128xf32> to vector<1x128xf32>
    %38 = vector.broadcast %37 : vector<1x128xf32> to vector<8x128xf32>
    %39 = arith.addf %35, %38 : vector<8x128xf32>
    %cst_31 = arith.constant 0.000000e+00 : f32
    %40 = vector.broadcast %cst_31 : f32 to vector<8x128xf32>
    %41 = arith.maximumf %39, %40 : vector<8x128xf32>
    %42 = arith.truncf %41 : vector<8x128xf32> to vector<8x128xbf16>
    %c0_32 = arith.constant 0 : index
    %c384 = arith.constant 384 : index
    %43 = vector.load %arg9[%c0_32, %c384] : memref<8x640xbf16, #tpu.memory_space<vmem>>, vector<8x128xbf16>
    tpu.vector_store %arg9[%c0_32, %c384], %42 {strides = array<i32>} : memref<8x640xbf16, #tpu.memory_space<vmem>>, vector<8x128xbf16>,
    %c3 = arith.constant 3 : index
    %c0_33 = arith.constant 0 : index
    %c0_34 = arith.constant 0 : index
    %44 = vector.load %arg4[%c3, %c0_33, %c0_34] : memref<4x128x128xbf16, #tpu.memory_space<vmem>>, vector<1x128x128xbf16>
    %45 = vector.shape_cast %44 : vector<1x128x128xbf16> to vector<128x128xbf16>
    %cst_35 = arith.constant dense<0.000000e+00> : vector<8x128xf32>
    %46 = tpu.matmul %42, %45, %cst_35 {dimension_numbers = #tpu.dot_dimension_numbers<[1], [0], [0], [1], [0, 0, 1, 1], [], []>} : vector<8x128xbf16>, vector<128x128xbf16>, vector<8x128xf32> -> vector<8x128xf32>
    %c3_36 = arith.constant 3 : index
    %c0_37 = arith.constant 0 : index
    %c0_38 = arith.constant 0 : index
    %47 = vector.load %arg5[%c3_36, %c0_37, %c0_38] : memref<4x1x128xf32, #tpu.memory_space<vmem>>, vector<1x1x128xf32>
    %48 = vector.shape_cast %47 : vector<1x1x128xf32> to vector<1x128xf32>
    %49 = vector.broadcast %48 : vector<1x128xf32> to vector<8x128xf32>
    %50 = arith.addf %46, %49 : vector<8x128xf32>
    %cst_39 = arith.constant 0.000000e+00 : f32
    %51 = vector.broadcast %cst_39 : f32 to vector<8x128xf32>
    %52 = arith.maximumf %50, %51 : vector<8x128xf32>
    %53 = arith.truncf %52 : vector<8x128xf32> to vector<8x128xbf16>
    %c0_40 = arith.constant 0 : index
    %c512 = arith.constant 512 : index
    %54 = vector.load %arg9[%c0_40, %c512] : memref<8x640xbf16, #tpu.memory_space<vmem>>, vector<8x128xbf16>
    tpu.vector_store %arg9[%c0_40, %c512], %53 {strides = array<i32>} : memref<8x640xbf16, #tpu.memory_space<vmem>>, vector<8x128xbf16>,
    %c0_41 = arith.constant 0 : index
    %c0_42 = arith.constant 0 : index
    %55 = vector.load %arg9[%c0_41, %c0_42] : memref<8x640xbf16, #tpu.memory_space<vmem>>, vector<8x640xbf16>
    %c0_43 = arith.constant 0 : index
    %c0_44 = arith.constant 0 : index
    %56 = vector.load %arg6[%c0_43, %c0_44] : memref<640x128xbf16, #tpu.memory_space<vmem>>, vector<640x128xbf16>
    %cst_45 = arith.constant dense<0.000000e+00> : vector<8x128xf32>
    %57 = tpu.matmul %55, %56, %cst_45 {dimension_numbers = #tpu.dot_dimension_numbers<[1], [0], [0], [1], [0, 0, 1, 1], [], []>} : vector<8x640xbf16>, vector<640x128xbf16>, vector<8x128xf32> -> vector<8x128xf32>
    %c0_46 = arith.constant 0 : index
    %c0_47 = arith.constant 0 : index
    %58 = vector.load %arg7[%c0_46, %c0_47] : memref<1x128xf32, #tpu.memory_space<vmem>>, vector<1x128xf32>
    %59 = vector.broadcast %58 : vector<1x128xf32> to vector<8x128xf32>
    %60 = arith.addf %57, %59 : vector<8x128xf32>
    %c0_48 = arith.constant 0 : index
    %c0_49 = arith.constant 0 : index
    %61 = vector.load %arg8[%c0_48, %c0_49] : memref<8x128xf32, #tpu.memory_space<vmem>>, vector<8x128xf32>
    tpu.vector_store %arg8[%c0_48, %c0_49], %60 {strides = array<i32>} : memref<8x128xf32, #tpu.memory_space<vmem>>, vector<8x128xf32>,
    return
  }
  func.func @transform_0(%arg0: i32) -> (i32, i32) {
    %c0_i32 = arith.constant 0 : i32
    %c0_i32_0 = arith.constant 0 : i32
    return %arg0, %c0_i32 : i32, i32
  }
  func.func @transform_1(%arg0: i32) -> (i32, i32) {
    %c0_i32 = arith.constant 0 : i32
    %c0_i32_0 = arith.constant 0 : i32
    %c0_i32_1 = arith.constant 0 : i32
    return %c0_i32, %c0_i32_0 : i32, i32
  }
  func.func @transform_2(%arg0: i32) -> (i32, i32) {
    %c0_i32 = arith.constant 0 : i32
    %c0_i32_0 = arith.constant 0 : i32
    %c0_i32_1 = arith.constant 0 : i32
    return %c0_i32, %c0_i32_0 : i32, i32
  }
  func.func @transform_3(%arg0: i32) -> (i32, i32, i32) {
    %c0_i32 = arith.constant 0 : i32
    %c0_i32_0 = arith.constant 0 : i32
    %c0_i32_1 = arith.constant 0 : i32
    %c0_i32_2 = arith.constant 0 : i32
    return %c0_i32, %c0_i32_0, %c0_i32_1 : i32, i32, i32
  }
  func.func @transform_4(%arg0: i32) -> (i32, i32, i32) {
    %c0_i32 = arith.constant 0 : i32
    %c0_i32_0 = arith.constant 0 : i32
    %c0_i32_1 = arith.constant 0 : i32
    %c0_i32_2 = arith.constant 0 : i32
    return %c0_i32, %c0_i32_0, %c0_i32_1 : i32, i32, i32
  }
  func.func @transform_5(%arg0: i32) -> (i32, i32) {
    %c0_i32 = arith.constant 0 : i32
    %c0_i32_0 = arith.constant 0 : i32
    %c0_i32_1 = arith.constant 0 : i32
    return %c0_i32, %c0_i32_0 : i32, i32
  }
  func.func @transform_6(%arg0: i32) -> (i32, i32) {
    %c0_i32 = arith.constant 0 : i32
    %c0_i32_0 = arith.constant 0 : i32
    %c0_i32_1 = arith.constant 0 : i32
    return %c0_i32, %c0_i32_0 : i32, i32
  }
  func.func @transform_7(%arg0: i32) -> (i32, i32) {
    %c0_i32 = arith.constant 0 : i32
    %c0_i32_0 = arith.constant 0 : i32
    return %arg0, %c0_i32 : i32, i32
  }
}

</mosaic_0001>

<bundles_post_ra>
// kernel: mlp_shared_head_forward.1
= control target key start
LH: loop header
LB: loop body
LE: loop exit
PB: predicated region body
PF: predicated region fallthrough
CT: control target
= control target key end

     0   :  { %12 = vsyncpa [#allocation4], 0  ;;  %s2109_s24 = smov [#allocation3]   ;;  %s2519_s0 = inlined_call_operand.vmem [shape: f32[8,784], index: 0, kind: input, shape index: {}]   ;;  %s2520_s1 = inlined_call_operand.vmem [shape: bf16[784,128], index: 1, kind: input, shape index: {}]   ;;  %s2521_s2 = inlined_call_operand.vmem [shape: f32[1,128], index: 2, kind: input, shape index: {}]   ;;  %s2522_s3 = inlined_call_operand.hbm [shape: bf16[4,128,128], index: 3, kind: input, shape index: {}]   ;;  %s2523_s4 = inlined_call_operand.vmem [shape: f32[4,1,128], index: 4, kind: input, shape index: {}]   ;;  %s2524_s5 = inlined_call_operand.vmem [shape: bf16[640,128], index: 5, kind: input, shape index: {}]   ;;  %s2525_s6 = inlined_call_operand.vmem [shape: f32[1,128], index: 6, kind: input, shape index: {}]   ;;  %s2526_s7 = inlined_call_operand.vmem [shape: f32[8,128], index: 7, kind: output, shape index: {}]  }
   0x1   :  { %s24_s25 = sshll.u32 %s2109_s24, 4  ;;  %s25_s25 = int_to_ptr.vmem [resolvable:$true] %s24_s25 }
   0x2   :  { %s2095_s26 = scalar_lea.vmem %s25_s25, 4096  ;;  %p2100_p1 = scmp.lt.s32.totalorder %s25_s25, %s25_s25 }
   0x3   :  { %p2096_p0 = scmp.ne.s32.totalorder %s25_s25, %s2095_s26  ;;  %p2101_p2 = scmp.lt.s32.totalorder %s2095_s26, %s2095_s26 }
   0x5   :  { %p2102_p3 = por %p2101_p2, %p2100_p1 }
   0x7   :  { %p2103_p4 = pnand %p2102_p3, %p2096_p0 }
   0x9   :  { %2106 = shalt.err (!%p2103_p4)
}
   0xa   :  { %s2110_s27 = smov 64   ;;  %s2111_s28 = smov 4  }
   0xb   :  { %30 = dma.hbm_to_vmem [thread:$0]  %s2522_s3, 4096, %s25_s25, [#allocation4], %s2110_s27, %s2110_s27, %s2111_s28  }
   0xc   :  { %2107 = dma.done.wait [#allocation4], 4096  }
   0xd   :  { %2108 = vsyncadd [#allocation4], 4294963200  ;;  %v1961_v0 = vld [vmem:[%s2520_s1 + $0x78] sm:$0xff]   ;;  %v1965_v4 = vld [vmem:[%s2520_s1 + $0x70] sm:$0xff]   ;;  %v2112_v44 = vmov 0.0   ;;  %vm2113_vm0 = vmmov 0  }
   0xe   :  { %v1962_v1 = vld [vmem:[%s2520_s1 + $0x38] sm:$0xff]   ;;  %1693 = vmatprep.subr.bf16.mxu0 %v1961_v0  ;;  %v1966_v5 = vld [vmem:[%s2520_s1 + $0x30] sm:$0xff]   ;;  %v1969_v8 = vld [vmem:[%s2520_s1 + $0x68] sm:$0xff]   ;;  %vm454_vm1 = vcmask 130048  }
   0xf   :  { %v1963_v2 = vld [vmem:[%s2520_s1 + $0xf8] sm:$0xff]   ;;  %1694 = vmatpush3.bf16.msra.mxu0 %v1962_v1  ;;  %v1967_v6 = vld [vmem:[%s2520_s1 + $0xf0] sm:$0xff]   ;;  %v1970_v9 = vld [vmem:[%s2520_s1 + $0x28] sm:$0xff]  }
  0x10   :  { %v1964_v3 = vld [vmem:[%s2520_s1 + $0xb8] sm:$0xff]   ;;  %1715 = vmatprep.subr.bf16.mxu1 %v1963_v2  ;;  %1695 = vmatprep.subr.bf16.mxu0 %v1965_v4  ;;  %v1968_v7 = vld [vmem:[%s2520_s1 + $0xb0] sm:$0xff]   ;;  %v1971_v10 = vld [vmem:[%s2520_s1 + $0xe8] sm:$0xff]  }
  0x11   :  { %1716 = vmatpush3.bf16.msra.mxu1 %v1964_v3  ;;  %v1972_v11 = vld [vmem:[%s2520_s1 + $0xa8] sm:$0xff]   ;;  %v1973_v12 = vld [vmem:[%s2520_s1 + $0x60] sm:$0xff]   ;;  %v1977_v16 = vld [vmem:[%s2520_s1 + $0x58] sm:$0xff]  }
  0x12   :  { %1717 = vmatprep.subr.bf16.mxu1 %v1967_v6  ;;  %v1974_v13 = vld [vmem:[%s2520_s1 + $0x20] sm:$0xff]   ;;  %v1978_v17 = vld [vmem:[%s2520_s1 + $0x18] sm:$0xff]   ;;  %v1981_v20 = vld [vmem:[%s2520_s1 + $0x50] sm:$0xff]  }
  0x13   :  { %1696 = vmatpush3.bf16.msra.mxu0 %v1966_v5  ;;  %v1975_v14 = vld [vmem:[%s2520_s1 + $0xe0] sm:$0xff]   ;;  %v1979_v18 = vld [vmem:[%s2520_s1 + $0xd8] sm:$0xff]   ;;  %v1982_v21 = vld [vmem:[%s2520_s1 + $0x10] sm:$0xff]  }
  0x14   :  { %1697 = vmatprep.subr.bf16.mxu0 %v1969_v8  ;;  %v1976_v15 = vld [vmem:[%s2520_s1 + $0xa0] sm:$0xff]   ;;  %v1980_v19 = vld [vmem:[%s2520_s1 + $0x98] sm:$0xff]   ;;  %v1983_v22 = vld [vmem:[%s2520_s1 + $0xd0] sm:$0xff]  }
  0x15   :  { %1718 = vmatpush3.bf16.msra.mxu1 %v1968_v7  ;;  %v1984_v23 = vld [vmem:[%s2520_s1 + $0x90] sm:$0xff]   ;;  %v1985_v24 = vld [vmem:[%s2520_s1 + $0x48] sm:$0xff]   ;;  %v1989_v28 = vld [vmem:[%s2520_s1 + $0x40] sm:$0xff]  }
  0x16   :  { %1719 = vmatprep.subr.bf16.mxu1 %v1971_v10  ;;  %v1986_v25 = vld [vmem:[%s2520_s1 + $0x8] sm:$0xff]   ;;  %v1990_v29 = vld [vmem:[%s2520_s1] sm:$0xff]   ;;  %v1993_v36 = vld [vmem:[%s2520_s1 + $0x178] sm:$0xff]  }
  0x17   :  { %1698 = vmatpush3.bf16.msra.mxu0 %v1970_v9  ;;  %v1987_v26 = vld [vmem:[%s2520_s1 + $0xc8] sm:$0xff]   ;;  %v1991_v30 = vld [vmem:[%s2520_s1 + $0xc0] sm:$0xff]   ;;  %v44_v37 = vld [vmem:[%s2519_s0 + $0x18] sm:$0xff] }
  0x18   :  { %1699 = vmatprep.subr.bf16.mxu0 %v1973_v12  ;;  %v1988_v27 = vld [vmem:[%s2520_s1 + $0x88] sm:$0xff]   ;;  %v1992_v33 = vld [vmem:[%s2520_s1 + $0x80] sm:$0xff]   ;;  %v51_v38 = vpack.c.bf16 %v44_v37, %v44_v37  ;;  %v1994_v39 = vld [vmem:[%s2520_s1 + $0x138] sm:$0xff]  }
  0x19   :  { %1720 = vmatpush3.bf16.msra.mxu1 %v1972_v11  ;;  %v42_v31 = vld [vmem:[%s2519_s0 + $0x8] sm:$0xff]  ;;  %v41_v34 = vld [vmem:[%s2519_s0] sm:$0xff]  ;;  %v43_v40 = vld [vmem:[%s2519_s0 + $0x10] sm:$0xff] }
  0x1a   :  { %1721 = vmatprep.subr.bf16.mxu1 %v1975_v14  ;;  %v49_v32 = vpack.c.bf16 %v42_v31, %v42_v31  ;;  %v48_v35 = vpack.c.bf16 %v41_v34, %v41_v34  ;;  %530 = vmatprep.mubr.bf16.mxu1 %v51_v38  ;;  %v50_v41 = vpack.c.bf16 %v43_v40, %v43_v40  ;;  %v1995_v42 = vld [vmem:[%s2520_s1 + $0x170] sm:$0xff]   ;;  %v1997_v45 = vld [vmem:[%s2520_s1 + $0x168] sm:$0xff]   ;;  %v1999_v47 = vld [vmem:[%s2520_s1 + $0x160] sm:$0xff]  }
  0x1b   :  { %1700 = vmatpush3.bf16.msra.mxu0 %v1974_v13  ;;  %v1996_v43 = vld [vmem:[%s2520_s1 + $0x130] sm:$0xff]   ;;  %v1998_v46 = vld [vmem:[%s2520_s1 + $0x128] sm:$0xff]   ;;  %v2000_v48 = vld [vmem:[%s2520_s1 + $0x120] sm:$0xff]  }
  0x1c   :  { %1701 = vmatprep.subr.bf16.mxu0 %v1977_v16  ;;  %490 = vmatprep.mubr.bf16.mxu0 %v49_v32  ;;  %v2001_v49 = vld [vmem:[%s2520_s1 + $0x158] sm:$0xff]   ;;  %v2003_v51 = vld [vmem:[%s2520_s1 + $0x150] sm:$0xff]   ;;  %v2009_v53 = vld [vmem:[%s2520_s1 + $0x180] sm:$0xff]  }
  0x1d   :  { %1722 = vmatpush3.bf16.msra.mxu1 %v1976_v15  ;;  %v2002_v50 = vld [vmem:[%s2520_s1 + $0x118] sm:$0xff]   ;;  %v2004_v52 = vld [vmem:[%s2520_s1 + $0x110] sm:$0xff]   ;;  %v46_v54 = vld [vmem:[%s2519_s0 + $0x28] sm:$0xff] }
  0x1e   :  { %1723 = vmatprep.subr.bf16.mxu1 %v1979_v18  ;;  %v2005_v55 = vld [vmem:[%s2520_s1 + $0x148] sm:$0xff]   ;;  %v53_v56 = vpack.c.bf16 %v46_v54, %v46_v54  ;;  %v47_v57 = vld [vmem:[%s2519_s0 + $0x30] sm:$0xff]  ;;  %v2007_v60 = vld [vmem:[%s2520_s1 + $0x140] sm:$0xff]  }
  0x1f   :  { %1702 = vmatpush3.bf16.msra.mxu0 %v1978_v17  ;;  %v54_v58 = vpack.c.bf16 %v47_v57, %v47_v57  ;;  %v2006_v59 = vld [vmem:[%s2520_s1 + $0x108] sm:$0xff]   ;;  %v2008_v61 = vld [vmem:[%s2520_s1 + $0x100] sm:$0xff]   ;;  %v2013_v3 = vld [vmem:[#allocation3 + $0x20] sm:$0xff]  }
  0x20   :  { %1703 = vmatprep.subr.bf16.mxu0 %v1981_v20  ;;  %v45_v62 = vld [vmem:[%s2519_s0 + $0x20] sm:$0xff]  ;;  %v2010_v0 = vld [vmem:[#allocation3 + $0x38] sm:$0xff]   ;;  %v2017_v7 = vld [vmem:[#allocation3] sm:$0xff]  }
  0x21   :  { %1724 = vmatpush3.bf16.msra.mxu1 %v1980_v19  ;;  %v52_v63 = vpack.c.bf16 %v45_v62, %v45_v62  ;;  %v2011_v1 = vld [vmem:[#allocation3 + $0x30] sm:$0xff]   ;;  %v2012_v2 = vld [vmem:[#allocation3 + $0x28] sm:$0xff]   ;;  %v2014_v4 = vld [vmem:[#allocation3 + $0x18] sm:$0xff]  }
  0x22   :  { %1725 = vmatprep.subr.bf16.mxu1 %v1983_v22  ;;  %v2015_v5 = vld [vmem:[#allocation3 + $0x10] sm:$0xff]   ;;  %v2016_v6 = vld [vmem:[#allocation3 + $0x8] sm:$0xff]   ;;  %v2018_v8 = vld [vmem:[#allocation3 + $0x78] sm:$0xff]  }
  0x23   :  { %1704 = vmatpush3.bf16.msra.mxu0 %v1982_v21  ;;  %v2019_v9 = vld [vmem:[#allocation3 + $0x70] sm:$0xff]   ;;  %v2020_v10 = vld [vmem:[#allocation3 + $0x68] sm:$0xff]   ;;  %v2021_v11 = vld [vmem:[#allocation3 + $0x60] sm:$0xff]  }
  0x24   :  { %1705 = vmatprep.subr.bf16.mxu0 %v1985_v24  ;;  %v2022_v12 = vld [vmem:[#allocation3 + $0x58] sm:$0xff]   ;;  %v2023_v13 = vld [vmem:[#allocation3 + $0x50] sm:$0xff]   ;;  %v2024_v40 = vld [vmem:[#allocation3 + $0x48] sm:$0xff]  }
  0x25   :  { %1726 = vmatpush3.bf16.msra.mxu1 %v1984_v23  ;;  %v2054_v62 = vld [vmem:[#allocation3 + $0xe8] sm:$0xff]  }
  0x26   :  { %1727 = vmatprep.subr.bf16.mxu1 %v1987_v26 }
  0x27   :  { %1706 = vmatpush3.bf16.msra.mxu0 %v1986_v25 }
  0x28   :  { %1707 = vmatprep.subr.bf16.mxu0 %v1989_v28 }
  0x29   :  { %1728 = vmatpush3.bf16.msra.mxu1 %v1988_v27  ;;  %v1557_v27 = vld [vmem:[%s2521_s2] ss:$0 sm:$0xff] }
  0x2a   :  { %1729 = vmatprep.subr.bf16.mxu1 %v1991_v30 }
  0x2b   :  { %1708 = vmatpush3.bf16.msra.mxu0 %v1990_v29 }
  0x2c   :  { %1737 = vmatprep.subr.bf16.mxu0 %v1993_v36 }
  0x2d   :  { %1730 = vmatpush3.bf16.msra.mxu1 %v1992_v33 }
  0x2e   :  { %491 = vmatmul.mubr.bf16.vlgmr.msra.gmra.mxu0 %v48_v35  ;;  %1850 = vmatprep.subr.bf16.mxu1 %v2112_v44 }
  0x2f   :  { %1738 = vmatpush3.bf16.msra.mxu0 %v1994_v39  ;;  %570 = vmatprep.mubr.bf16.mxu0 %v53_v56 }
  0x30   :  { %531 = vmatmul.mubr.bf16.vlgmr.msra.gmra.mxu1 %v50_v41  ;;  %1739 = vmatprep.subr.bf16.mxu0 %v1995_v42  ;;  %v2025_v41 = vld [vmem:[#allocation3 + $0x40] sm:$0xff]   ;;  %v2026_v42 = vld [vmem:[#allocation3 + $0xb8] sm:$0xff]  }
  0x31   :  { %1852 = vmatprep.mubr.msk.bf16.mxu1 %vm2113_vm0, %v2112_v44  ;;  %1851 = vmatpush3.bf16.msra.mxu1 %v2009_v53 }
  0x32   :  { %1856 = vmatprep.subr.bf16.mxu1 %v2112_v44 }
  0x33   :  { %1740 = vmatpush3.bf16.msra.mxu0 %v1996_v43  ;;  %v2027_v43 = vld [vmem:[#allocation3 + $0xb0] sm:$0xff]  }
  0x34   :  { %1741 = vmatprep.subr.bf16.mxu0 %v1997_v45  ;;  %v2028_v45 = vld [vmem:[#allocation3 + $0xa8] sm:$0xff]  }
  0x37   :  { %1742 = vmatpush3.bf16.msra.mxu0 %v1998_v46  ;;  %v2029_v46 = vld [vmem:[#allocation3 + $0xa0] sm:$0xff]  }
  0x38   :  { %1743 = vmatprep.subr.bf16.mxu0 %v1999_v47  ;;  %1853 = vmatmul.mubr.msk.bf16.vlgmr.msra.gmra.mxu1 %vm454_vm1, %v54_v58  ;;  %v2030_v47 = vld [vmem:[#allocation3 + $0x98] sm:$0xff]   ;;  %v2033_v58 = vld [vmem:[#allocation3 + $0x80] sm:$0xff]  }
  0x39   :  { %1872 = vmatprep.mubr.msk.bf16.mxu1 %vm2113_vm0, %v2112_v44  ;;  %1857 = vmatpush3.bf16.msra.mxu1 %v2010_v0  ;;  %v2056_v0 = vld [vmem:[#allocation3 + $0xd8] sm:$0xff]  }
  0x3a   :  { %1858 = vmatprep.subr.bf16.mxu1 %v2112_v44 }
  0x3b   :  { %1744 = vmatpush3.bf16.msra.mxu0 %v2000_v48  ;;  %v2031_v48 = vld [vmem:[#allocation3 + $0x90] sm:$0xff]  }
  0x3c   :  { %1745 = vmatprep.subr.bf16.mxu0 %v2001_v49  ;;  %v2032_v49 = vld [vmem:[#allocation3 + $0x88] sm:$0xff]  }
  0x3d   :  { %1859 = vmatpush3.bf16.msra.mxu1 %v2011_v1  ;;  %v2057_v1 = vld [vmem:[#allocation3 + $0xd0] sm:$0xff]  }
  0x3e   :  { %1860 = vmatprep.subr.bf16.mxu1 %v2112_v44 }
  0x3f   :  { %1746 = vmatpush3.bf16.msra.mxu0 %v2002_v50  ;;  %v1608_v50 = vld [vmem:[%s2523_s4] ss:$0 sm:$0xff] }
  0x40   :  { %1747 = vmatprep.subr.bf16.mxu0 %v2003_v51 }
  0x41   :  { %1861 = vmatpush3.bf16.msra.mxu1 %v2012_v2  ;;  %v2058_v2 = vld [vmem:[#allocation3 + $0xc8] sm:$0xff]  }
  0x42   :  { %1862 = vmatprep.subr.bf16.mxu1 %v2112_v44 }
  0x43   :  { %1748 = vmatpush3.bf16.msra.mxu0 %v2004_v52 }
  0x44   :  { %1749 = vmatprep.subr.bf16.mxu0 %v2005_v55 }
  0x45   :  { %1863 = vmatpush3.bf16.msra.mxu1 %v2013_v3  ;;  %v1618_v3 = vld [vmem:[%s2523_s4 + $0x1] ss:$0 sm:$0xff] }
  0x46   :  { %1864 = vmatprep.subr.bf16.mxu1 %v2112_v44 }
  0x47   :  { %1750 = vmatpush3.bf16.msra.mxu0 %v2006_v59  ;;  %v2034_v59 = vld [vmem:[%s2524_s5 + $0x78] sm:$0xff]  }
  0x48   :  { %1751 = vmatprep.subr.bf16.mxu0 %v2007_v60  ;;  %v2052_v60 = vld [vmem:[#allocation3 + $0xf8] sm:$0xff]  }
  0x49   :  { %1865 = vmatpush3.bf16.msra.mxu1 %v2014_v4 }
  0x4a   :  { %1866 = vmatprep.subr.bf16.mxu1 %v2112_v44 }
  0x4b   :  { %1752 = vmatpush3.bf16.msra.mxu0 %v2008_v61  ;;  %v2053_v61 = vld [vmem:[#allocation3 + $0xf0] sm:$0xff]  }
  0x4c   :  { %1876 = vmatprep.subr.bf16.mxu0 %v2112_v44 }
  0x4d   :  { %1867 = vmatpush3.bf16.msra.mxu1 %v2015_v5 }
  0x4e   :  { %571 = vmatmul.mubr.bf16.vlgmr.msra.gmra.mxu0 %v52_v63  ;;  %1868 = vmatprep.subr.bf16.mxu1 %v2112_v44  ;;  %v2055_v63 = vld [vmem:[#allocation3 + $0xe0] sm:$0xff]  }
  0x4f   :  { %1892 = vmatprep.mubr.msk.bf16.mxu0 %vm2113_vm0, %v2112_v44  ;;  %1877 = vmatpush3.bf16.msra.mxu0 %v2018_v8 }
  0x50   :  { %1878 = vmatprep.subr.bf16.mxu0 %v2112_v44 }
  0x51   :  { %1869 = vmatpush3.bf16.msra.mxu1 %v2016_v6 }
  0x52   :  { %1870 = vmatprep.subr.bf16.mxu1 %v2112_v44 }
  0x53   :  { %1879 = vmatpush3.bf16.msra.mxu0 %v2019_v9 }
  0x54   :  { %1880 = vmatprep.subr.bf16.mxu0 %v2112_v44 }
  0x55   :  { %1871 = vmatpush3.bf16.msra.mxu1 %v2017_v7 }
  0x56   :  { %1896 = vmatprep.subr.bf16.mxu1 %v2112_v44 }
  0x57   :  { %1881 = vmatpush3.bf16.msra.mxu0 %v2020_v10  ;;  %v2035_v10 = vld [vmem:[%s2524_s5 + $0x38] sm:$0xff]  }
  0x58   :  { %1882 = vmatprep.subr.bf16.mxu0 %v2112_v44 }
  0x5b   :  { %1883 = vmatpush3.bf16.msra.mxu0 %v2021_v11 }
  0x5c   :  { %1884 = vmatprep.subr.bf16.mxu0 %v2112_v44 }
  0x5f   :  { %1885 = vmatpush3.bf16.msra.mxu0 %v2022_v12  ;;  %v2038_v12 = vld [vmem:[%s2524_s5 + $0x70] sm:$0xff]  }
  0x60   :  { %1886 = vmatprep.subr.bf16.mxu0 %v2112_v44 }
  0x63   :  { %1887 = vmatpush3.bf16.msra.mxu0 %v2023_v13 }
  0x64   :  { %1888 = vmatprep.subr.bf16.mxu0 %v2112_v44 }
  0x67   :  { %1889 = vmatpush3.bf16.msra.mxu0 %v2024_v40 }
  0x68   :  { %1890 = vmatprep.subr.bf16.mxu0 %v2112_v44 }
  0x6b   :  { %1891 = vmatpush3.bf16.msra.mxu0 %v2025_v41  ;;  %v2061_v41 = vld [vmem:[%s2524_s5 + $0xb8] sm:$0xff]  }
  0x6c   :  { %1916 = vmatprep.subr.bf16.mxu0 %v2112_v44 }
  0xee   :  { %v1709_v14 = vpop.f32.mrf.mxu0 }
  0xf0   :  { %v1710_v15 = vpop.f32.mrf.mxu0  ;;  %v1731_v16 = vpop.f32.mrf.mxu1 }
  0xf1   :  { %v1711_v26 = vadd.f32 %v1710_v15, %v1709_v14  ;;  %v2039_v15 = vld [vmem:[%s2524_s5 + $0x30] sm:$0xff]  }
  0xf2   :  { %v1712_v17 = vpop.f32.mrf.mxu0  ;;  %v1732_v18 = vpop.f32.mrf.mxu1 }
  0xf3   :  { %v493_v28 = vadd.f32 %v1711_v26, %v1557_v27  ;;  %v1733_v29 = vadd.f32 %v1732_v18, %v1731_v16  ;;  %v2040_v16 = vld [vmem:[%s2524_s5 + $0x68] sm:$0xff]   ;;  %v2042_v18 = vld [vmem:[%s2524_s5 + $0x60] sm:$0xff]  }
  0xf4   :  { %v1713_v19 = vpop.f32.mrf.mxu0  ;;  %v1734_v20 = vpop.f32.mrf.mxu1  ;;  %v2041_v17 = vld [vmem:[%s2524_s5 + $0x28] sm:$0xff]   ;;  %v2050_v26 = vld [vmem:[%s2524_s5 + $0x40] sm:$0xff]  }
  0xf5   :  { %v533_v32 = vadd.f32 %v1733_v29, %v493_v28  ;;  %v2043_v19 = vld [vmem:[%s2524_s5 + $0x20] sm:$0xff]   ;;  %v2044_v20 = vld [vmem:[%s2524_s5 + $0x58] sm:$0xff]  }
  0xf6   :  { %v1735_v21 = vpop.f32.mrf.mxu1  ;;  %v2051_v27 = vld [vmem:[%s2524_s5] sm:$0xff]   ;;  %v2059_v29 = vld [vmem:[#allocation3 + $0xc0] sm:$0xff]  }
  0xf7   :  { %v2045_v21 = vld [vmem:[%s2524_s5 + $0x18] sm:$0xff]  }
  0xf8   :  { %v612_v22 = vpop.f32.mrf.mxu1 }
  0xfa   :  { %v1854_v23 = vpop.f32.mrf.mxu1 }
  0xfb   :  { %v2047_v23 = vld [vmem:[%s2524_s5 + $0x10] sm:$0xff]  }
  0xfc   :  { %v615_v24 = vpop.f32.mrf.mxu1 }
  0xfd   :  { %v2048_v24 = vld [vmem:[%s2524_s5 + $0x48] sm:$0xff]  }
  0xfe   :  { %v1855_v25 = vpop.f32.mrf.mxu1 }
  0xff   :  { %v2049_v25 = vld [vmem:[%s2524_s5 + $0x8] sm:$0xff]  }
 0x10e   :  { %v1753_v30 = vpop.f32.mrf.mxu0 }
 0x110   :  { %v1754_v31 = vpop.f32.mrf.mxu0 }
 0x111   :  { %v1755_v33 = vadd.f32 %v1754_v31, %v1753_v30  ;;  %v2060_v30 = vld [vmem:[%s2524_s5 + $0xf8] sm:$0xff]  }
 0x112   :  { %v1756_v34 = vpop.f32.mrf.mxu0  ;;  %v2078_v31 = vld [vmem:[%s2524_s5 + $0x138] sm:$0xff]  }
 0x113   :  { %v573_v35 = vadd.f32 %v1755_v33, %v533_v32  ;;  %v2079_v32 = vld [vmem:[%s2524_s5 + $0x130] sm:$0xff]   ;;  %v2080_v33 = vld [vmem:[%s2524_s5 + $0x128] sm:$0xff]   ;;  %v2081_v34 = vld [vmem:[%s2524_s5 + $0x120] sm:$0xff]  }
 0x114   :  { %v1757_v36 = vpop.f32.mrf.mxu0 }
 0x115   :  { %v613_v37 = vadd.f32 %v612_v22, %v573_v35  ;;  %v2046_v22 = vld [vmem:[%s2524_s5 + $0x50] sm:$0xff]   ;;  %v1628_v35 = vld [vmem:[%s2523_s4 + $0x2] ss:$0 sm:$0xff] }
 0x117   :  { %v618_v38 = vmax.f32 %v613_v37, 0.0 }
 0x119   :  { %v619_v39 = vpack.c.bf16 %v618_v38, %v618_v38 }
 0x11b   :  { %620 = vst [vmem:[#allocation2] sm:$0xf] %v619_v39  ;;  %1873 = vmatmul.mubr.bf16.vlgmr.msra.gmra.mxu1 %v619_v39 }
 0x11c   :  { %1912 = vmatprep.mubr.msk.bf16.mxu1 %vm2113_vm0, %v2112_v44  ;;  %1897 = vmatpush3.bf16.msra.mxu1 %v2026_v42 }
 0x11d   :  { %1898 = vmatprep.subr.bf16.mxu1 %v2112_v44 }
 0x120   :  { %1899 = vmatpush3.bf16.msra.mxu1 %v2027_v43  ;;  %v2062_v43 = vld [vmem:[%s2524_s5 + $0xf0] sm:$0xff]  }
 0x121   :  { %1900 = vmatprep.subr.bf16.mxu1 %v2112_v44 }
 0x124   :  { %1901 = vmatpush3.bf16.msra.mxu1 %v2028_v45 }
 0x125   :  { %1902 = vmatprep.subr.bf16.mxu1 %v2112_v44 }
 0x128   :  { %1903 = vmatpush3.bf16.msra.mxu1 %v2029_v46  ;;  %v2063_v46 = vld [vmem:[%s2524_s5 + $0xb0] sm:$0xff]  }
 0x129   :  { %1904 = vmatprep.subr.bf16.mxu1 %v2112_v44 }
 0x12c   :  { %1905 = vmatpush3.bf16.msra.mxu1 %v2030_v47  ;;  %v2064_v47 = vld [vmem:[%s2524_s5 + $0xe8] sm:$0xff]  }
 0x12d   :  { %1906 = vmatprep.subr.bf16.mxu1 %v2112_v44 }
 0x130   :  { %1907 = vmatpush3.bf16.msra.mxu1 %v2031_v48  ;;  %v2065_v48 = vld [vmem:[%s2524_s5 + $0xa8] sm:$0xff]  }
 0x131   :  { %1908 = vmatprep.subr.bf16.mxu1 %v2112_v44 }
 0x134   :  { %1909 = vmatpush3.bf16.msra.mxu1 %v2032_v49  ;;  %v2068_v49 = vld [vmem:[%s2524_s5 + $0xe0] sm:$0xff]  }
 0x135   :  { %1910 = vmatprep.subr.bf16.mxu1 %v2112_v44 }
 0x138   :  { %1911 = vmatpush3.bf16.msra.mxu1 %v2033_v58  ;;  %v2075_v58 = vld [vmem:[%s2524_s5 + $0x88] sm:$0xff]  }
 0x139   :  { %1797 = vmatprep.subr.bf16.mxu1 %v2034_v59  ;;  %v2076_v59 = vld [vmem:[%s2524_s5 + $0xc0] sm:$0xff]  }
 0x1db   :  { %v726_v51 = vpop.f32.mrf.mxu1 }
 0x1dc   :  { %v727_v52 = vadd.f32 %v1608_v50, %v726_v51 }
 0x1dd   :  { %v1874_v53 = vpop.f32.mrf.mxu1 }
 0x1de   :  { %v732_v54 = vmax.f32 %v727_v52, 0.0  ;;  %v2069_v52 = vld [vmem:[%s2524_s5 + $0xa0] sm:$0xff]   ;;  %v2070_v53 = vld [vmem:[%s2524_s5 + $0xd8] sm:$0xff]  }
 0x1df   :  { %v729_v55 = vpop.f32.mrf.mxu1 }
 0x1e0   :  { %v733_v56 = vpack.c.bf16 %v732_v54, %v732_v54  ;;  %v2071_v54 = vld [vmem:[%s2524_s5 + $0x98] sm:$0xff]   ;;  %v2072_v55 = vld [vmem:[%s2524_s5 + $0xd0] sm:$0xff]  }
 0x1e1   :  { %v1875_v57 = vpop.f32.mrf.mxu1 }
 0x1e2   :  { %734 = vst [vmem:[#allocation2 + $0x4] sm:$0xf] %v733_v56  ;;  %1893 = vmatmul.mubr.bf16.vlgmr.msra.gmra.mxu0 %v733_v56  ;;  %v2073_v56 = vld [vmem:[%s2524_s5 + $0x90] sm:$0xff]   ;;  %v2074_v57 = vld [vmem:[%s2524_s5 + $0xc8] sm:$0xff]  }
 0x1e3   :  { %1932 = vmatprep.mubr.msk.bf16.mxu0 %vm2113_vm0, %v2112_v44  ;;  %1917 = vmatpush3.bf16.msra.mxu0 %v2052_v60 }
 0x1e4   :  { %1918 = vmatprep.subr.bf16.mxu0 %v2112_v44 }
 0x1e7   :  { %1919 = vmatpush3.bf16.msra.mxu0 %v2053_v61  ;;  %v2077_v61 = vld [vmem:[%s2524_s5 + $0x80] sm:$0xff]  }
 0x1e8   :  { %1920 = vmatprep.subr.bf16.mxu0 %v2112_v44 }
 0x1e9   :  { %v1083_v8 = vld [vmem:[#allocation2] sm:$0xff] }
 0x1ea   :  { %v1649_v14 = vcombine.high %v1083_v8, %v1083_v8  ;;  %v1648_v28 = vcombine.low %v1083_v8, %v1083_v8 }
 0x1eb   :  { %1921 = vmatpush3.bf16.msra.mxu0 %v2054_v62 }
 0x1ec   :  { %1922 = vmatprep.subr.bf16.mxu0 %v2112_v44 }
 0x1ef   :  { %1923 = vmatpush3.bf16.msra.mxu0 %v2055_v63 }
 0x1f0   :  { %1924 = vmatprep.subr.bf16.mxu0 %v2112_v44 }
 0x1f3   :  { %1925 = vmatpush3.bf16.msra.mxu0 %v2056_v0 }
 0x1f4   :  { %1926 = vmatprep.subr.bf16.mxu0 %v2112_v44 }
 0x1f7   :  { %1927 = vmatpush3.bf16.msra.mxu0 %v2057_v1 }
 0x1f8   :  { %1928 = vmatprep.subr.bf16.mxu0 %v2112_v44 }
 0x1fb   :  { %1929 = vmatpush3.bf16.msra.mxu0 %v2058_v2 }
 0x1fc   :  { %1930 = vmatprep.subr.bf16.mxu0 %v2112_v44 }
 0x1ff   :  { %1931 = vmatpush3.bf16.msra.mxu0 %v2059_v29 }
 0x200   :  { %1819 = vmatprep.subr.bf16.mxu0 %v2060_v30 }
 0x2a2   :  { %v842_v4 = vpop.f32.mrf.mxu0 }
 0x2a3   :  { %v843_v5 = vadd.f32 %v1618_v3, %v842_v4  ;;  %v2082_v3 = vld [vmem:[%s2524_s5 + $0x118] sm:$0xff]   ;;  %v2083_v4 = vld [vmem:[%s2524_s5 + $0x110] sm:$0xff]  }
 0x2a4   :  { %v1894_v6 = vpop.f32.mrf.mxu0 }
 0x2a5   :  { %v848_v7 = vmax.f32 %v843_v5, 0.0  ;;  %v2084_v5 = vld [vmem:[%s2524_s5 + $0x108] sm:$0xff]   ;;  %v2085_v6 = vld [vmem:[%s2524_s5 + $0x100] sm:$0xff]  }
 0x2a6   :  { %v845_v9 = vpop.f32.mrf.mxu0 }
 0x2a7   :  { %v849_v11 = vpack.c.bf16 %v848_v7, %v848_v7  ;;  %v1638_v7 = vld [vmem:[%s2523_s4 + $0x3] ss:$0 sm:$0xff] }
 0x2a8   :  { %v1895_v13 = vpop.f32.mrf.mxu0 }
 0x2a9   :  { %850 = vst [vmem:[#allocation2 + $0x8] sm:$0xf] %v849_v11  ;;  %1913 = vmatmul.mubr.bf16.vlgmr.msra.gmra.mxu1 %v849_v11 }
 0x2aa   :  { %1798 = vmatpush3.bf16.msra.mxu1 %v2035_v10  ;;  %1463 = vmatprep.mubr.bf16.mxu1 %v1649_v14 }
 0x2ab   :  { %1799 = vmatprep.subr.bf16.mxu1 %v2038_v12 }
 0x2ae   :  { %1800 = vmatpush3.bf16.msra.mxu1 %v2039_v15 }
 0x2af   :  { %1801 = vmatprep.subr.bf16.mxu1 %v2040_v16  ;;  %v1647_v16 = vld [vmem:[%s2525_s6] ss:$0 sm:$0xff] }
 0x2b2   :  { %1802 = vmatpush3.bf16.msra.mxu1 %v2041_v17 }
 0x2b3   :  { %1803 = vmatprep.subr.bf16.mxu1 %v2042_v18 }
 0x2b6   :  { %1804 = vmatpush3.bf16.msra.mxu1 %v2043_v19 }
 0x2b7   :  { %1805 = vmatprep.subr.bf16.mxu1 %v2044_v20 }
 0x2ba   :  { %1806 = vmatpush3.bf16.msra.mxu1 %v2045_v21 }
 0x2bb   :  { %1807 = vmatprep.subr.bf16.mxu1 %v2046_v22 }
 0x2be   :  { %1808 = vmatpush3.bf16.msra.mxu1 %v2047_v23 }
 0x2bf   :  { %1809 = vmatprep.subr.bf16.mxu1 %v2048_v24 }
 0x2c2   :  { %1810 = vmatpush3.bf16.msra.mxu1 %v2049_v25 }
 0x2c3   :  { %1811 = vmatprep.subr.bf16.mxu1 %v2050_v26 }
 0x2c6   :  { %1812 = vmatpush3.bf16.msra.mxu1 %v2051_v27 }
 0x2c7   :  { %1936 = vmatprep.subr.bf16.mxu1 %v2112_v44 }
 0x2c9   :  { %1464 = vmatmul.mubr.bf16.vlgmr.msra.gmra.mxu1 %v1648_v28 }
 0x2ca   :  { %1952 = vmatprep.mubr.msk.bf16.mxu1 %vm2113_vm0, %v2112_v44  ;;  %1937 = vmatpush3.bf16.msra.mxu1 %v2078_v31 }
 0x2cb   :  { %1938 = vmatprep.subr.bf16.mxu1 %v2112_v44 }
 0x2ce   :  { %1939 = vmatpush3.bf16.msra.mxu1 %v2079_v32 }
 0x2cf   :  { %1940 = vmatprep.subr.bf16.mxu1 %v2112_v44 }
 0x2d2   :  { %1941 = vmatpush3.bf16.msra.mxu1 %v2080_v33 }
 0x2d3   :  { %1942 = vmatprep.subr.bf16.mxu1 %v2112_v44 }
 0x2d6   :  { %1943 = vmatpush3.bf16.msra.mxu1 %v2081_v34 }
 0x2d7   :  { %1944 = vmatprep.subr.bf16.mxu1 %v2112_v44 }
 0x2da   :  { %1945 = vmatpush3.bf16.msra.mxu1 %v2082_v3 }
 0x2db   :  { %1946 = vmatprep.subr.bf16.mxu1 %v2112_v44 }
 0x2de   :  { %1947 = vmatpush3.bf16.msra.mxu1 %v2083_v4 }
 0x2df   :  { %1948 = vmatprep.subr.bf16.mxu1 %v2112_v44 }
 0x2e2   :  { %1949 = vmatpush3.bf16.msra.mxu1 %v2084_v5 }
 0x2e3   :  { %1950 = vmatprep.subr.bf16.mxu1 %v2112_v44 }
 0x2e6   :  { %1951 = vmatpush3.bf16.msra.mxu1 %v2085_v6 }
 0x369   :  { %v958_v36 = vpop.f32.mrf.mxu1 }
 0x36a   :  { %v959_v37 = vadd.f32 %v1628_v35, %v958_v36 }
 0x36b   :  { %v1914_v38 = vpop.f32.mrf.mxu1 }
 0x36c   :  { %v964_v39 = vmax.f32 %v959_v37, 0.0 }
 0x36d   :  { %v961_v40 = vpop.f32.mrf.mxu1 }
 0x36e   :  { %v965_v42 = vpack.c.bf16 %v964_v39, %v964_v39 }
 0x36f   :  { %v1915_v45 = vpop.f32.mrf.mxu1 }
 0x370   :  { %966 = vst [vmem:[#allocation2 + $0xc] sm:$0xf] %v965_v42  ;;  %1933 = vmatmul.mubr.bf16.vlgmr.msra.gmra.mxu0 %v965_v42 }
 0x371   :  { %1820 = vmatpush3.bf16.msra.mxu0 %v2061_v41 }
 0x372   :  { %1821 = vmatprep.subr.bf16.mxu0 %v2062_v43 }
 0x375   :  { %1822 = vmatpush3.bf16.msra.mxu0 %v2063_v46 }
 0x376   :  { %1823 = vmatprep.subr.bf16.mxu0 %v2064_v47 }
 0x377   :  { %v1084_v50 = vld [vmem:[#allocation2 + $0x8] sm:$0xff] }
 0x378   :  { %v1651_v51 = vcombine.high %v1084_v50, %v1084_v50  ;;  %v1650_v1 = vcombine.low %v1084_v50, %v1084_v50 }
 0x379   :  { %1824 = vmatpush3.bf16.msra.mxu0 %v2065_v48 }
 0x37a   :  { %1503 = vmatprep.mubr.bf16.mxu0 %v1651_v51  ;;  %1825 = vmatprep.subr.bf16.mxu0 %v2068_v49 }
 0x37d   :  { %1826 = vmatpush3.bf16.msra.mxu0 %v2069_v52 }
 0x37e   :  { %1827 = vmatprep.subr.bf16.mxu0 %v2070_v53 }
 0x381   :  { %1828 = vmatpush3.bf16.msra.mxu0 %v2071_v54 }
 0x382   :  { %1829 = vmatprep.subr.bf16.mxu0 %v2072_v55 }
 0x385   :  { %1830 = vmatpush3.bf16.msra.mxu0 %v2073_v56 }
 0x386   :  { %1831 = vmatprep.subr.bf16.mxu0 %v2074_v57 }
 0x389   :  { %v1813_v60 = vpop.f32.mrf.mxu1  ;;  %1832 = vmatpush3.bf16.msra.mxu0 %v2075_v58 }
 0x38a   :  { %1833 = vmatprep.subr.bf16.mxu0 %v2076_v59 }
 0x38b   :  { %v1814_v62 = vpop.f32.mrf.mxu1 }
 0x38c   :  { %v1815_v63 = vadd.f32 %v1814_v62, %v1813_v60 }
 0x38d   :  { %v1816_v0 = vpop.f32.mrf.mxu1  ;;  %1834 = vmatpush3.bf16.msra.mxu0 %v2077_v61 }
 0x38e   :  { %v1466_v18 = vadd.f32 %v1815_v63, %v1647_v16 }
 0x38f   :  { %v1817_v2 = vpop.f32.mrf.mxu1 }
 0x390   :  { %1504 = vmatmul.mubr.bf16.vlgmr.msra.gmra.mxu0 %v1650_v1 }
 0x430   :  { %v1074_v8 = vpop.f32.mrf.mxu0 }
 0x431   :  { %v1075_v9 = vadd.f32 %v1638_v7, %v1074_v8 }
 0x432   :  { %v1934_v10 = vpop.f32.mrf.mxu0 }
 0x433   :  { %v1080_v11 = vmax.f32 %v1075_v9, 0.0 }
 0x434   :  { %v1077_v12 = vpop.f32.mrf.mxu0 }
 0x435   :  { %v1081_v13 = vpack.c.bf16 %v1080_v11, %v1080_v11 }
 0x436   :  { %v1935_v14 = vpop.f32.mrf.mxu0 }
 0x437   :  { %1082 = vst [vmem:[#allocation2 + $0x10] sm:$0xf] %v1081_v13 }
 0x43e   :  { %v2086_v15 = vld [vmem:[#allocation2 + $0x10] ss:$0 sps:$4 sm:$0xff]  }
 0x43f   :  { %1953 = vmatmul.mubr.bf16.vlgmr.msra.gmra.mxu1 %v2086_v15 }
 0x450   :  { %v1835_v44 = vpop.f32.mrf.mxu0 }
 0x452   :  { %v1836_v17 = vpop.f32.mrf.mxu0 }
 0x453   :  { %v1837_v19 = vadd.f32 %v1836_v17, %v1835_v44 }
 0x454   :  { %v1838_v20 = vpop.f32.mrf.mxu0 }
 0x455   :  { %v1506_v21 = vadd.f32 %v1837_v19, %v1466_v18 }
 0x456   :  { %v1839_v22 = vpop.f32.mrf.mxu0 }
 0x4ff   :  { %v1545_v23 = vpop.f32.mrf.mxu1 }
 0x500   :  { %v1546_v24 = vadd.f32 %v1545_v23, %v1506_v21 }
 0x501   :  { %v1954_v25 = vpop.f32.mrf.mxu1 }
 0x502   :  { %1551 = vst [vmem:[%s2526_s7] sm:$0xff] %v1546_v24 }
 0x503   :  { %v1548_v26 = vpop.f32.mrf.mxu1 }
 0x505   :  { %v1955_v27 = vpop.f32.mrf.mxu1 }
 0x506   :  { %1556 = vsyncpa [#allocation4], 1 }

</bundles_post_ra>
